<compile_context>
chip_gen: v7x
topology: tpu7x:2x2x1
jax: 0.10.0
libtpu: 0.0.40
codegen_flags: <defaults>
</compile_context>

<pallas_src>
import functools

import jax
import jax.numpy as jnp
from jax.experimental import pallas as pl
from jax.experimental.pallas import tpu as pltpu


LANES = 128          # lane width == hidden_dim; every packed block is this wide
TB_MAX = 512         # max batch rows per grid step (review: 512-1024 is the sweet spot)


def _round_up(x, m):
    return (x + m - 1) // m * m


# ----------------------------------------------------------------------------
# Kernel: one batch tile of the whole fused MLP chain.
#   xs_ref : (TB, state_dim)  bf16      xa_ref : (TB, hidden)   bf16
#   w_ref  : (state_dim + 4*128, 128) bf16   [w1 | w2 | w3@wh1 | blockdiag(wh2)]
#   b_ref  : (8, 128) f32                    [b1; b2; b3@wh1+bh1; bh2; 0...]
#   out_ref: (TB, 128) bf16   (lanes 0:3 = parameters logits->sigmoid, 3 = eff)
# ----------------------------------------------------------------------------
def _strategy_kernel(xs_ref, xa_ref, w_ref, b_ref, out_ref, *, state_dim, hidden_dim):
    f32, bf16 = jnp.float32, jnp.bfloat16
    H = hidden_dim

    biases = b_ref[...]                      # (8, 128) f32, one vreg
    b1, b2, b3h1, bh2 = biases[0:1, :], biases[1:2, :], biases[2:3, :], biases[3:4, :]

    # Layer 1: split-K (state rows + adversary rows of w1), no in-kernel concat.
    h1 = jnp.dot(xs_ref[...], w_ref[pl.ds(0, state_dim), :],
                 preferred_element_type=f32)
    h1 = h1 + jnp.dot(xa_ref[...], w_ref[pl.ds(state_dim, H), :],
                      preferred_element_type=f32)
    h1 = jnp.maximum(h1 + b1, 0.0)

    # Layer 2: Linear + ReLU.
    h2 = jnp.maximum(
        jnp.dot(h1.astype(bf16), w_ref[pl.ds(state_dim + H, H), :],
                preferred_element_type=f32) + b2, 0.0)

    # Folded generator layer 3 + head layer 1 (no nonlinearity between them).
    hh = jnp.maximum(
        jnp.dot(h2.astype(bf16), w_ref[pl.ds(state_dim + 2 * H, H), :],
                preferred_element_type=f32) + b3h1, 0.0)

    # Fused block-diagonal head layer 2 + sigmoid (both heads end in sigmoid).
    logits = jnp.dot(hh.astype(bf16), w_ref[pl.ds(state_dim + 3 * H, H), :],
                     preferred_element_type=f32) + bh2
    out_ref[...] = jax.nn.sigmoid(logits).astype(out_ref.dtype)


# ----------------------------------------------------------------------------
# Wrapper: bf16 activations, batch padding, 1-D batch grid, lane-dense bf16 out.
# ----------------------------------------------------------------------------
@jax.jit
def strategy_generator_forward(state, adversary_encoding, wslab, btile):
    batch, state_dim = state.shape
    hidden_dim = adversary_encoding.shape[1]
    assert hidden_dim == LANES, "kernel assumes hidden_dim == 128"

    xs = state.astype(jnp.bfloat16)
    xa = adversary_encoding.astype(jnp.bfloat16)

    # Batch tile: multiple of 16 (bf16 sublane tile), capped at TB_MAX.
    tb = min(TB_MAX, _round_up(batch, 16))
    bp = _round_up(batch, tb)
    pad = bp - batch
    if pad:  # static under jit
        xs = jnp.pad(xs, ((0, pad), (0, 0)))
        xa = jnp.pad(xa, ((0, pad), (0, 0)))

    grid = (bp // tb,)
    slab_rows = wslab.shape[0]

    cost = pl.CostEstimate(
        flops=2 * bp * LANES * (state_dim + 3 * hidden_dim + LANES),
        transcendentals=bp * LANES,
        bytes_accessed=(xs.size * 2 + xa.size * 2 + wslab.size * 2
                        + btile.size * 4 + bp * LANES * 2),
    )

    out = pl.pallas_call(
        functools.partial(_strategy_kernel, state_dim=state_dim,
                          hidden_dim=hidden_dim),
        out_shape=jax.ShapeDtypeStruct((bp, LANES), jnp.bfloat16),
        grid=grid,
        in_specs=[
            pl.BlockSpec((tb, state_dim), lambda i: (i, 0)),       # state tile
            pl.BlockSpec((tb, hidden_dim), lambda i: (i, 0)),      # adversary tile
            pl.BlockSpec((slab_rows, LANES), lambda i: (0, 0)),    # weights, resident
            pl.BlockSpec((8, LANES), lambda i: (0, 0)),            # biases, resident
        ],
        out_specs=pl.BlockSpec((tb, LANES), lambda i: (i, 0)),
        compiler_params=pltpu.CompilerParams(
            dimension_semantics=("parallel",)),
        cost_estimate=cost,
    )(xs, xa, wslab, btile)

    parameters = out[:batch, 0:3].astype(jnp.float32)
    effectiveness = out[:batch, 3:4].astype(jnp.float32)
    return parameters, effectiveness


# ----------------------------------------------------------------------------
# One-time parameter packing (NOT per call).
#   weight slab (state_dim + 4*128, 128) bf16:
#     rows [0, state_dim)              : w1 state rows
#     rows [state_dim, +128)           : w1 adversary rows
#     rows next 128                    : w2
#     rows next 128                    : w3 @ [pw1 | ew1]        (folded, padded)
#     rows next 128                    : blockdiag(pw2, ew2)     (padded)
#   bias tile (8, 128) f32: b1, b2, b3@[pw1|ew1]+[pb1|eb1], [pb2|eb2], zeros.
# ----------------------------------------------------------------------------
def pack_params(params, state_dim, hidden_dim=128, strategy_dim=64):
    assert hidden_dim == LANES, "packing assumes hidden_dim == 128"
    assert state_dim % 16 == 0, "state_dim must be bf16-sublane-tile aligned"
    half = strategy_dim // 2
    f32 = jnp.float32

    w1 = params["w1"].astype(f32)                                  # (state+128, 128)
    w2 = params["w2"].astype(f32)                                  # (128, 128)

    # Fused head layer 1: [pw1 | ew1] -> (strategy_dim, strategy_dim)
    wh1 = jnp.concatenate([params["pw1"], params["ew1"]], axis=1).astype(f32)
    # Fold generator layer 3 into it (no intervening nonlinearity): (128, 64)
    w3h1 = params["w3"].astype(f32) @ wh1
    w3h1 = jnp.pad(w3h1, ((0, 0), (0, LANES - strategy_dim)))      # (128, 128)

    # Fused head layer 2: block-diagonal [[pw2, 0], [0, ew2]] -> (128, 128)
    wh2 = jnp.zeros((LANES, LANES), f32)
    wh2 = wh2.at[0:half, 0:3].set(params["pw2"].astype(f32))
    wh2 = wh2.at[half:strategy_dim, 3:4].set(params["ew2"].astype(f32))

    wslab = jnp.concatenate([w1, w2, w3h1, wh2], axis=0).astype(jnp.bfloat16)
    assert wslab.shape == (state_dim + hidden_dim + 3 * LANES, LANES)

    def pad_row(b):
        b = jnp.asarray(b, f32).reshape(1, -1)
        return jnp.pad(b, ((0, 0), (0, LANES - b.shape[1])))

    bh1 = jnp.concatenate([params["pb1"].reshape(1, -1),
                           params["eb1"].reshape(1, -1)], axis=1).astype(f32)
    b3h1 = params["b3"].reshape(1, -1).astype(f32) @ wh1 + bh1     # (1, 64)
    bh2 = jnp.concatenate([params["pb2"].reshape(1, -1),
                           params["eb2"].reshape(1, -1)], axis=1).astype(f32)

    btile = jnp.concatenate(
        [pad_row(params["b1"]), pad_row(params["b2"]), pad_row(b3h1),
         pad_row(bh2), jnp.zeros((4, LANES), f32)], axis=0)
    assert btile.shape == (8, LANES)
    return wslab, btile


# ----------------------------------------------------------------------------
# Deterministic PyTorch-style U(-1/sqrt(fan_in), 1/sqrt(fan_in)) init.
# Weights stored as (in_features, out_features); biases as (1, out_features).
# ----------------------------------------------------------------------------
def init_params(key, state_dim, hidden_dim=128, strategy_dim=64):
    def linear(key, fan_in, fan_out):
        kw, kb = jax.random.split(key)
        bound = 1.0 / jnp.sqrt(fan_in)
        w = jax.random.uniform(kw, (fan_in, fan_out), jnp.float32, -bound, bound)
        b = jax.random.uniform(kb, (1, fan_out), jnp.float32, -bound, bound)
        return w, b

    keys = jax.random.split(key, 7)
    half = strategy_dim // 2
    w1, b1 = linear(keys[0], state_dim + hidden_dim, hidden_dim)
    w2, b2 = linear(keys[1], hidden_dim, hidden_dim)
    w3, b3 = linear(keys[2], hidden_dim, strategy_dim)
    pw1, pb1 = linear(keys[3], strategy_dim, half)
    pw2, pb2 = linear(keys[4], half, 3)
    ew1, eb1 = linear(keys[5], strategy_dim, half)
    ew2, eb2 = linear(keys[6], half, 1)
    return dict(
        w1=w1, b1=b1, w2=w2, b2=b2, w3=w3, b3=b3,
        pw1=pw1, pb1=pb1, pw2=pw2, pb2=pb2,
        ew1=ew1, eb1=eb1, ew2=ew2, eb2=eb2,
    )


# ----------------------------------------------------------------------------
# References.
#  - reference_forward: original (unfused, f32) module semantics; loose tol
#    because the kernel stores bf16 weights / casts activations to bf16.
#  - matched_reference: same folded math, same bf16 rounding points as the
#    kernel (built from the packed slab); tight tolerance.
# ----------------------------------------------------------------------------
def reference_forward(state, adv, params):
    def lin(x, w, b):
        return jnp.dot(x, w, preferred_element_type=jnp.float32) + b

    combined = jnp.concatenate([state, adv], axis=-1)
    h = jnp.maximum(lin(combined, params["w1"], params["b1"]), 0.0)
    h = jnp.maximum(lin(h, params["w2"], params["b2"]), 0.0)
    feat = lin(h, params["w3"], params["b3"])
    ph = jnp.maximum(lin(feat, params["pw1"], params["pb1"]), 0.0)
    p = jax.nn.sigmoid(lin(ph, params["pw2"], params["pb2"]))
    eh = jnp.maximum(lin(feat, params["ew1"], params["eb1"]), 0.0)
    e = jax.nn.sigmoid(lin(eh, params["ew2"], params["eb2"]))
    return p, e


def matched_reference(state, adv, wslab, btile):
    f32, bf16 = jnp.float32, jnp.bfloat16
    sd = state.shape[1]
    H = LANES
    xs, xa = state.astype(bf16), adv.astype(bf16)
    w, b = wslab, btile
    h1 = (jnp.dot(xs, w[0:sd], preferred_element_type=f32)
          + jnp.dot(xa, w[sd:sd + H], preferred_element_type=f32) + b[0:1])
    h1 = jnp.maximum(h1, 0.0)
    h2 = jnp.maximum(jnp.dot(h1.astype(bf16), w[sd + H:sd + 2 * H],
                             preferred_element_type=f32) + b[1:2], 0.0)
    hh = jnp.maximum(jnp.dot(h2.astype(bf16), w[sd + 2 * H:sd + 3 * H],
                             preferred_element_type=f32) + b[2:3], 0.0)
    logits = jnp.dot(hh.astype(bf16), w[sd + 3 * H:sd + 4 * H],
                     preferred_element_type=f32) + b[3:4]
    out = jax.nn.sigmoid(logits).astype(bf16).astype(f32)
    return out[:, 0:3], out[:, 3:4]


if __name__ == "__main__":
    batch = 8
    state_dim = 32
    hidden_dim = 128
    strategy_dim = 64

    key = jax.random.PRNGKey(0)
    k_params, k_state, k_adv = jax.random.split(key, 3)

    params = init_params(k_params, state_dim, hidden_dim, strategy_dim)
    wslab, btile = pack_params(params, state_dim, hidden_dim, strategy_dim)

    state = jax.random.normal(k_state, (batch, state_dim), jnp.float32)
    adversary_encoding = jax.random.normal(k_adv, (batch, hidden_dim), jnp.float32)

    parameters, effectiveness = strategy_generator_forward(
        state, adversary_encoding, wslab, btile)
    jax.block_until_ready((parameters, effectiveness))

    assert parameters.shape == (batch, 3)
    assert effectiveness.shape == (batch, 1)

    # Tight check against a reference with the kernel's exact rounding points.
    p_m, e_m = matched_reference(state, adversary_encoding, wslab, btile)
    assert jnp.allclose(parameters, p_m, atol=2e-3), "params mismatch (matched ref)"
    assert jnp.allclose(effectiveness, e_m, atol=2e-3), "eff mismatch (matched ref)"

    # Loose check against the original full-f32 module semantics.
    p_f32, e_f32 = reference_forward(state, adversary_encoding, params)
    assert jnp.allclose(parameters, p_f32, atol=3e-2), "params mismatch (f32 ref)"
    assert jnp.allclose(effectiveness, e_f32, atol=3e-2), "eff mismatch (f32 ref)"

    print("KERNEL_OK")
</pallas_src>

<mosaic_0001>
module attributes {stable_mosaic.version = 11 : i64} {
  func.func @_strategy_kernel(%arg0: i32, %arg1: memref<16x32xbf16, #tpu.memory_space<vmem>>, %arg2: memref<16x128xbf16, #tpu.memory_space<vmem>>, %arg3: memref<544x128xbf16, #tpu.memory_space<vmem>>, %arg4: memref<8x128xf32, #tpu.memory_space<vmem>>, %arg5: memref<16x128xbf16, #tpu.memory_space<vmem>>) attributes {dimension_semantics = [#tpu.dimension_semantics<parallel>], iteration_bounds = array<i64: 1>, scalar_prefetch = 0 : i64, scratch_operands = 0 : i64, tpu.core_type = #tpu.core_type<tc>, window_params = [{transform_indices = @transform_0, window_bounds = array<i64: 16, 32>}, {transform_indices = @transform_1, window_bounds = array<i64: 16, 128>}, {pipeline_mode = #tpu.pipeline_mode<synchronous>, transform_indices = @transform_2, window_bounds = array<i64: 544, 128>}, {pipeline_mode = #tpu.pipeline_mode<synchronous>, transform_indices = @transform_3, window_bounds = array<i64: 8, 128>}, {transform_indices = @transform_4, window_bounds = array<i64: 16, 128>}]} {
    %c0 = arith.constant 0 : index
    %c0_0 = arith.constant 0 : index
    %0 = vector.load %arg4[%c0, %c0_0] : memref<8x128xf32, #tpu.memory_space<vmem>>, vector<8x128xf32>
    %1 = vector.extract_strided_slice %0 {offsets = [0, 0], sizes = [1, 128], strides = [1, 1]} : vector<8x128xf32> to vector<1x128xf32>
    %2 = vector.extract_strided_slice %0 {offsets = [1, 0], sizes = [1, 128], strides = [1, 1]} : vector<8x128xf32> to vector<1x128xf32>
    %3 = vector.extract_strided_slice %0 {offsets = [2, 0], sizes = [1, 128], strides = [1, 1]} : vector<8x128xf32> to vector<1x128xf32>
    %4 = vector.extract_strided_slice %0 {offsets = [3, 0], sizes = [1, 128], strides = [1, 1]} : vector<8x128xf32> to vector<1x128xf32>
    %c0_1 = arith.constant 0 : index
    %c0_2 = arith.constant 0 : index
    %5 = vector.load %arg1[%c0_1, %c0_2] : memref<16x32xbf16, #tpu.memory_space<vmem>>, vector<16x32xbf16>
    %c0_3 = arith.constant 0 : index
    %c0_4 = arith.constant 0 : index
    %6 = vector.load %arg3[%c0_3, %c0_4] : memref<544x128xbf16, #tpu.memory_space<vmem>>, vector<32x128xbf16>
    %cst = arith.constant dense<0.000000e+00> : vector<16x128xf32>
    %7 = tpu.matmul %5, %6, %cst {dimension_numbers = #tpu.dot_dimension_numbers<[1], [0], [0], [1], [0, 0, 1, 1], [], []>} : vector<16x32xbf16>, vector<32x128xbf16>, vector<16x128xf32> -> vector<16x128xf32>
    %c0_5 = arith.constant 0 : index
    %c0_6 = arith.constant 0 : index
    %8 = vector.load %arg2[%c0_5, %c0_6] : memref<16x128xbf16, #tpu.memory_space<vmem>>, vector<16x128xbf16>
    %c32 = arith.constant 32 : index
    %c0_7 = arith.constant 0 : index
    %9 = vector.load %arg3[%c32, %c0_7] : memref<544x128xbf16, #tpu.memory_space<vmem>>, vector<128x128xbf16>
    %cst_8 = arith.constant dense<0.000000e+00> : vector<16x128xf32>
    %10 = tpu.matmul %8, %9, %cst_8 {dimension_numbers = #tpu.dot_dimension_numbers<[1], [0], [0], [1], [0, 0, 1, 1], [], []>} : vector<16x128xbf16>, vector<128x128xbf16>, vector<16x128xf32> -> vector<16x128xf32>
    %11 = arith.addf %7, %10 : vector<16x128xf32>
    %12 = vector.broadcast %1 : vector<1x128xf32> to vector<16x128xf32>
    %13 = arith.addf %11, %12 : vector<16x128xf32>
    %cst_9 = arith.constant 0.000000e+00 : f32
    %14 = vector.broadcast %cst_9 : f32 to vector<16x128xf32>
    %15 = arith.maximumf %13, %14 : vector<16x128xf32>
    %16 = arith.truncf %15 : vector<16x128xf32> to vector<16x128xbf16>
    %c160 = arith.constant 160 : index
    %c0_10 = arith.constant 0 : index
    %17 = vector.load %arg3[%c160, %c0_10] : memref<544x128xbf16, #tpu.memory_space<vmem>>, vector<128x128xbf16>
    %cst_11 = arith.constant dense<0.000000e+00> : vector<16x128xf32>
    %18 = tpu.matmul %16, %17, %cst_11 {dimension_numbers = #tpu.dot_dimension_numbers<[1], [0], [0], [1], [0, 0, 1, 1], [], []>} : vector<16x128xbf16>, vector<128x128xbf16>, vector<16x128xf32> -> vector<16x128xf32>
    %19 = vector.broadcast %2 : vector<1x128xf32> to vector<16x128xf32>
    %20 = arith.addf %18, %19 : vector<16x128xf32>
    %cst_12 = arith.constant 0.000000e+00 : f32
    %21 = vector.broadcast %cst_12 : f32 to vector<16x128xf32>
    %22 = arith.maximumf %20, %21 : vector<16x128xf32>
    %23 = arith.truncf %22 : vector<16x128xf32> to vector<16x128xbf16>
    %c288 = arith.constant 288 : index
    %c0_13 = arith.constant 0 : index
    %24 = vector.load %arg3[%c288, %c0_13] : memref<544x128xbf16, #tpu.memory_space<vmem>>, vector<128x128xbf16>
    %cst_14 = arith.constant dense<0.000000e+00> : vector<16x128xf32>
    %25 = tpu.matmul %23, %24, %cst_14 {dimension_numbers = #tpu.dot_dimension_numbers<[1], [0], [0], [1], [0, 0, 1, 1], [], []>} : vector<16x128xbf16>, vector<128x128xbf16>, vector<16x128xf32> -> vector<16x128xf32>
    %26 = vector.broadcast %3 : vector<1x128xf32> to vector<16x128xf32>
    %27 = arith.addf %25, %26 : vector<16x128xf32>
    %cst_15 = arith.constant 0.000000e+00 : f32
    %28 = vector.broadcast %cst_15 : f32 to vector<16x128xf32>
    %29 = arith.maximumf %27, %28 : vector<16x128xf32>
    %30 = arith.truncf %29 : vector<16x128xf32> to vector<16x128xbf16>
    %c416 = arith.constant 416 : index
    %c0_16 = arith.constant 0 : index
    %31 = vector.load %arg3[%c416, %c0_16] : memref<544x128xbf16, #tpu.memory_space<vmem>>, vector<128x128xbf16>
    %cst_17 = arith.constant dense<0.000000e+00> : vector<16x128xf32>
    %32 = tpu.matmul %30, %31, %cst_17 {dimension_numbers = #tpu.dot_dimension_numbers<[1], [0], [0], [1], [0, 0, 1, 1], [], []>} : vector<16x128xbf16>, vector<128x128xbf16>, vector<16x128xf32> -> vector<16x128xf32>
    %33 = vector.broadcast %4 : vector<1x128xf32> to vector<16x128xf32>
    %34 = arith.addf %32, %33 : vector<16x128xf32>
    %35 = arith.negf %34 : vector<16x128xf32>
    %36 = math.exp %35 : vector<16x128xf32>
    %cst_18 = arith.constant 1.000000e+00 : f32
    %37 = vector.broadcast %cst_18 : f32 to vector<16x128xf32>
    %38 = arith.addf %37, %36 : vector<16x128xf32>
    %39 = arith.divf %37, %38 : vector<16x128xf32>
    %40 = arith.truncf %39 : vector<16x128xf32> to vector<16x128xbf16>
    %c0_19 = arith.constant 0 : index
    %c0_20 = arith.constant 0 : index
    %41 = vector.load %arg5[%c0_19, %c0_20] : memref<16x128xbf16, #tpu.memory_space<vmem>>, vector<16x128xbf16>
    tpu.vector_store %arg5[%c0_19, %c0_20], %40 {strides = array<i32>} : memref<16x128xbf16, #tpu.memory_space<vmem>>, vector<16x128xbf16>,
    return
  }
  func.func @transform_0(%arg0: i32) -> (i32, i32) {
    %c0_i32 = arith.constant 0 : i32
    %c0_i32_0 = arith.constant 0 : i32
    return %arg0, %c0_i32 : i32, i32
  }
  func.func @transform_1(%arg0: i32) -> (i32, i32) {
    %c0_i32 = arith.constant 0 : i32
    %c0_i32_0 = arith.constant 0 : i32
    return %arg0, %c0_i32 : i32, i32
  }
  func.func @transform_2(%arg0: i32) -> (i32, i32) {
    %c0_i32 = arith.constant 0 : i32
    %c0_i32_0 = arith.constant 0 : i32
    %c0_i32_1 = arith.constant 0 : i32
    return %c0_i32, %c0_i32_0 : i32, i32
  }
  func.func @transform_3(%arg0: i32) -> (i32, i32) {
    %c0_i32 = arith.constant 0 : i32
    %c0_i32_0 = arith.constant 0 : i32
    %c0_i32_1 = arith.constant 0 : i32
    return %c0_i32, %c0_i32_0 : i32, i32
  }
  func.func @transform_4(%arg0: i32) -> (i32, i32) {
    %c0_i32 = arith.constant 0 : i32
    %c0_i32_0 = arith.constant 0 : i32
    return %arg0, %c0_i32 : i32, i32
  }
}

</mosaic_0001>

<bundles_post_ra>
// kernel: strategy_generator_forward.1
= control target key start
LH: loop header
LB: loop body
LE: loop exit
PB: predicated region body
PF: predicated region fallthrough
CT: control target
= control target key end

     0   :  { %9 = vsyncpa [#allocation3], 0  ;;  %s831_s15 = smov [#allocation2]   ;;  %s941_s0 = inlined_call_operand.vmem [shape: bf16[16,32], index: 0, kind: input, shape index: {}]   ;;  %s942_s1 = inlined_call_operand.vmem [shape: bf16[16,128], index: 1, kind: input, shape index: {}]   ;;  %s943_s2 = inlined_call_operand.hbm [shape: bf16[544,128], index: 2, kind: input, shape index: {}]   ;;  %s944_s3 = inlined_call_operand.vmem [shape: f32[8,128], index: 3, kind: input, shape index: {}]   ;;  %s945_s4 = inlined_call_operand.vmem [shape: bf16[16,128], index: 4, kind: output, shape index: {}]  }
   0x1   :  { %s19_s16 = sshll.u32 %s831_s15, 4  ;;  %s807_s19 = scalar_lea.hbm %s943_s2, 4352  ;;  %s20_s16 = int_to_ptr.vmem [resolvable:$true] %s19_s16 }
   0x2   :  { %p808_p0 = scmp.ne.s32.totalorder %s943_s2, %s807_s19  ;;  %p811_p1 = scmp.lt.u32.totalorder %s807_s19, %s943_s2 }
   0x4   :  { %p813_p2 = pnand %p811_p1, %p808_p0 }
   0x6   :  { %816 = shalt.err (!%p813_p2)
}
   0x7   :  { %s817_s24 = scalar_lea.vmem %s20_s16, 4352  ;;  %p822_p4 = scmp.lt.s32.totalorder %s20_s16, %s20_s16 }
   0x8   :  { %p818_p3 = scmp.ne.s32.totalorder %s20_s16, %s817_s24  ;;  %p823_p5 = scmp.lt.s32.totalorder %s817_s24, %s817_s24 }
   0xa   :  { %p824_p6 = por %p823_p5, %p822_p4 }
   0xc   :  { %p825_p7 = pnand %p824_p6, %p818_p3 }
   0xe   :  { %828 = shalt.err (!%p825_p7)
}
   0xf   :  { %s832_s25 = smov 64   ;;  %s833_s26 = smov 4  }
  0x10   :  { %25 = dma.hbm_to_vmem [thread:$0]  %s943_s2, 4352, %s20_s16, [#allocation3], %s832_s25, %s832_s25, %s833_s26  }
  0x11   :  { %829 = dma.done.wait [#allocation3], 4352  }
  0x12   :  { %830 = vsyncadd [#allocation3], 4294962944  ;;  %v834_v0 = vmov 0.0   ;;  %vm835_vm0 = vmmov 0   ;;  %v763_v1 = vld [vmem:[#allocation2 + $0x10] sm:$0xff]   ;;  %v764_v2 = vld [vmem:[#allocation2 + $0x18] sm:$0xff]   ;;  %v214_v31 = vlaneseq }
  0x13   :  { %670 = vmatprep.subr.bf16.mxu0 %v834_v0  ;;  %690 = vmatprep.subr.bf16.mxu1 %v834_v0  ;;  %v765_v3 = vld [vmem:[#allocation2 + $0x20] sm:$0xff]   ;;  %v771_v5 = vld [vmem:[#allocation2 + $0x8] sm:$0xff]   ;;  %vm169_vm1 = vcmask 261120   ;;  %v775_v8 = vld [vmem:[#allocation2 + $0x50] sm:$0xff]  }
  0x14   :  { %694 = vmatprep.mubr.msk.bf16.mxu1 %vm835_vm0, %v834_v0  ;;  %686 = vmatprep.mubr.msk.bf16.mxu0 %vm835_vm0, %v834_v0  ;;  %v769_v4 = vld [vmem:[#allocation2] sm:$0xff]   ;;  %v766_v6 = vld [vmem:[#allocation2 + $0x28] sm:$0xff]   ;;  %v767_v9 = vld [vmem:[#allocation2 + $0x30] sm:$0xff]   ;;  %v913_v32 = vshrl.u32 %v214_v31, 7 }
  0x15   :  { %671 = vmatpush3.bf16.msra.mxu0 %v763_v1  ;;  %691 = vmatpush3.bf16.msra.mxu1 %v769_v4  ;;  %v773_v7 = vld [vmem:[%s941_s0] sm:$0xff]   ;;  %v768_v10 = vld [vmem:[#allocation2 + $0x38] sm:$0xff]   ;;  %v778_v14 = vld [vmem:[#allocation2 + $0x68] sm:$0xff]  }
  0x16   :  { %672 = vmatprep.subr.bf16.mxu0 %v834_v0  ;;  %692 = vmatprep.subr.bf16.mxu1 %v834_v0  ;;  %v776_v11 = vld [vmem:[#allocation2 + $0x58] sm:$0xff]   ;;  %v777_v12 = vld [vmem:[#allocation2 + $0x60] sm:$0xff]   ;;  %v772_v15 = vld [vmem:[#allocation2 + $0x48] sm:$0xff]   ;;  %v216_v33 = vsub.s32 0, %v913_v32  ;;  %v241_v55 = vsub.s32 1, %v913_v32 }
  0x17   :  { %v770_v13 = vld [vmem:[#allocation2 + $0x40] sm:$0xff]   ;;  %v779_v16 = vld [vmem:[#allocation2 + $0x70] sm:$0xff]   ;;  %v780_v18 = vld [vmem:[#allocation2 + $0x78] sm:$0xff]  }
  0x18   :  { %v774_v17 = vld [vmem:[%s942_s1] sm:$0xff]   ;;  %v782_v20 = vld [vmem:[#allocation2 + $0x88] sm:$0xff]   ;;  %v783_v21 = vld [vmem:[#allocation2 + $0x90] sm:$0xff]  }
  0x19   :  { %673 = vmatpush3.bf16.msra.mxu0 %v764_v2  ;;  %693 = vmatpush3.bf16.msra.mxu1 %v771_v5  ;;  %v781_v19 = vld [vmem:[#allocation2 + $0x80] sm:$0xff]   ;;  %v784_v22 = vld [vmem:[#allocation2 + $0x98] sm:$0xff]   ;;  %v786_v24 = vld [vmem:[#allocation2 + $0xa8] sm:$0xff]   ;;  %v353_v5 = vsub.s32 2, %v913_v32 }
  0x1a   :  { %674 = vmatprep.subr.bf16.mxu0 %v834_v0  ;;  %698 = vmatprep.subr.bf16.mxu1 %v834_v0  ;;  %v785_v23 = vld [vmem:[#allocation2 + $0xa0] sm:$0xff]   ;;  %v787_v25 = vld [vmem:[#allocation2 + $0xb0] sm:$0xff]   ;;  %v788_v26 = vld [vmem:[#allocation2 + $0xb8] sm:$0xff]  }
  0x1b   :  { %v919_v34 = vld [vmem:[%s944_s3] sm:$0xff]  ;;  %v790_v48 = vld [vmem:[#allocation2 + $0xc8] sm:$0xff]   ;;  %v791_v49 = vld [vmem:[#allocation2 + $0xd0] sm:$0xff]  }
  0x1c   :  { %695 = vmatmul.mubr.msk.bf16.vlgmr.msra.gmra.mrb[0].mxu1 %vm169_vm1, %v773_v7  ;;  %v217_v35 = vrot.slane %v919_v34, %v216_v33  ;;  %v789_v47 = vld [vmem:[#allocation2 + $0xc0] sm:$0xff]   ;;  %v792_v50 = vld [vmem:[#allocation2 + $0xd8] sm:$0xff]   ;;  %v794_v52 = vld [vmem:[#allocation2 + $0xe8] sm:$0xff]   ;;  %v242_v56 = vrot.slane %v919_v34, %v241_v55 }
  0x1d   :  { %675 = vmatpush3.bf16.msra.mxu0 %v765_v3  ;;  %699 = vmatpush3.bf16.msra.mxu1 %v775_v8  ;;  %v793_v51 = vld [vmem:[#allocation2 + $0xe0] sm:$0xff]   ;;  %v795_v53 = vld [vmem:[#allocation2 + $0xf0] sm:$0xff]   ;;  %v796_v54 = vld [vmem:[#allocation2 + $0xf8] sm:$0xff]  }
  0x1e   :  { %676 = vmatprep.subr.bf16.mxu0 %v834_v0  ;;  %714 = vmatprep.mubr.msk.bf16.mxu1 %vm835_vm0, %v834_v0  ;;  %v797_v3 = vld [vmem:[#allocation2 + $0x100] sm:$0xff]   ;;  %v798_v4 = vld [vmem:[#allocation2 + $0x108] sm:$0xff]  }
  0x1f   :  { %700 = vmatprep.subr.bf16.mxu1 %v834_v0 }
  0x21   :  { %677 = vmatpush3.bf16.msra.mxu0 %v766_v6  ;;  %701 = vmatpush3.bf16.msra.mxu1 %v776_v11  ;;  %v354_v6 = vrot.slane %v919_v34, %v353_v5 }
  0x22   :  { %678 = vmatprep.subr.bf16.mxu0 %v834_v0  ;;  %702 = vmatprep.subr.bf16.mxu1 %v834_v0 }
  0x25   :  { %679 = vmatpush3.bf16.msra.mxu0 %v767_v9  ;;  %703 = vmatpush3.bf16.msra.mxu1 %v777_v12 }
  0x26   :  { %680 = vmatprep.subr.bf16.mxu0 %v834_v0  ;;  %704 = vmatprep.subr.bf16.mxu1 %v834_v0 }
  0x29   :  { %681 = vmatpush3.bf16.msra.mxu0 %v768_v10  ;;  %705 = vmatpush3.bf16.msra.mxu1 %v778_v14 }
  0x2a   :  { %682 = vmatprep.subr.bf16.mxu0 %v834_v0  ;;  %706 = vmatprep.subr.bf16.mxu1 %v834_v0 }
  0x2d   :  { %683 = vmatpush3.bf16.msra.mxu0 %v770_v13  ;;  %707 = vmatpush3.bf16.msra.mxu1 %v779_v16  ;;  %v465_v16 = vsub.s32 3, %v913_v32 }
  0x2e   :  { %684 = vmatprep.subr.bf16.mxu0 %v834_v0  ;;  %708 = vmatprep.subr.bf16.mxu1 %v834_v0 }
  0x31   :  { %685 = vmatpush3.bf16.msra.mxu0 %v772_v15  ;;  %709 = vmatpush3.bf16.msra.mxu1 %v780_v18 }
  0x32   :  { %718 = vmatprep.subr.bf16.mxu0 %v834_v0  ;;  %710 = vmatprep.subr.bf16.mxu1 %v834_v0 }
  0x34   :  { %687 = vmatmul.mubr.bf16.vlgmr.msra.gmra.mrb[0].mxu0 %v774_v17 }
  0x35   :  { %734 = vmatprep.mubr.msk.bf16.mxu0 %vm835_vm0, %v834_v0  ;;  %711 = vmatpush3.bf16.msra.mxu1 %v781_v19 }
  0x36   :  { %712 = vmatprep.subr.bf16.mxu1 %v834_v0  ;;  %719 = vmatpush3.bf16.msra.mxu0 %v783_v21 }
  0x37   :  { %720 = vmatprep.subr.bf16.mxu0 %v834_v0 }
  0x39   :  { %713 = vmatpush3.bf16.msra.mxu1 %v782_v20 }
  0x3a   :  { %738 = vmatprep.subr.bf16.mxu1 %v834_v0  ;;  %721 = vmatpush3.bf16.msra.mxu0 %v784_v22 }
  0x3b   :  { %722 = vmatprep.subr.bf16.mxu0 %v834_v0 }
  0x3e   :  { %723 = vmatpush3.bf16.msra.mxu0 %v785_v23 }
  0x3f   :  { %724 = vmatprep.subr.bf16.mxu0 %v834_v0 }
  0x42   :  { %725 = vmatpush3.bf16.msra.mxu0 %v786_v24 }
  0x43   :  { %726 = vmatprep.subr.bf16.mxu0 %v834_v0 }
  0x46   :  { %727 = vmatpush3.bf16.msra.mxu0 %v787_v25 }
  0x47   :  { %728 = vmatprep.subr.bf16.mxu0 %v834_v0 }
  0x4a   :  { %729 = vmatpush3.bf16.msra.mxu0 %v788_v26 }
  0x4b   :  { %730 = vmatprep.subr.bf16.mxu0 %v834_v0 }
  0x4e   :  { %731 = vmatpush3.bf16.msra.mxu0 %v789_v47 }
  0x4f   :  { %732 = vmatprep.subr.bf16.mxu0 %v834_v0 }
  0x52   :  { %733 = vmatpush3.bf16.msra.mxu0 %v790_v48 }
  0xef   :  { %v207_v27 = vpop.f32.mrb[0].mxu1 }
  0xf0   :  { %v696_v28 = vpop.f32.mrb[1].mxu1 }
  0xf1   :  { %v210_v29 = vpop.f32.mrb[2].mxu1 }
  0xf2   :  { %v697_v30 = vpop.f32.mrb[3].mxu1 }
 0x107   :  { %v145_v36 = vpop.f32.mrb[0].mxu0 }
 0x108   :  { %v208_v37 = vadd.f32 %v207_v27, %v145_v36  ;;  %v688_v38 = vpop.f32.mrb[1].mxu0 }
 0x109   :  { %v148_v39 = vpop.f32.mrb[2].mxu0 }
 0x10a   :  { %v218_v40 = vadd.f32 %v217_v35, %v208_v37  ;;  %v211_v41 = vadd.f32 %v210_v29, %v148_v39  ;;  %v689_v42 = vpop.f32.mrb[3].mxu0 }
 0x10c   :  { %v219_v43 = vadd.f32 %v217_v35, %v211_v41  ;;  %v220_v44 = vmax.f32 %v218_v40, 0.0 }
 0x10e   :  { %v221_v45 = vmax.f32 %v219_v43, 0.0 }
 0x110   :  { %v222_v46 = vpack.c.bf16 %v221_v45, %v220_v44 }
 0x112   :  { %715 = vmatmul.mubr.bf16.vlgmr.msra.gmra.mrb[4].mxu1 %v222_v46 }
 0x113   :  { %754 = vmatprep.mubr.msk.bf16.mxu1 %vm835_vm0, %v834_v0  ;;  %739 = vmatpush3.bf16.msra.mxu1 %v791_v49 }
 0x114   :  { %740 = vmatprep.subr.bf16.mxu1 %v834_v0 }
 0x117   :  { %741 = vmatpush3.bf16.msra.mxu1 %v792_v50 }
 0x118   :  { %742 = vmatprep.subr.bf16.mxu1 %v834_v0 }
 0x11b   :  { %743 = vmatpush3.bf16.msra.mxu1 %v793_v51 }
 0x11c   :  { %744 = vmatprep.subr.bf16.mxu1 %v834_v0 }
 0x11f   :  { %745 = vmatpush3.bf16.msra.mxu1 %v794_v52 }
 0x120   :  { %746 = vmatprep.subr.bf16.mxu1 %v834_v0 }
 0x123   :  { %747 = vmatpush3.bf16.msra.mxu1 %v795_v53 }
 0x124   :  { %748 = vmatprep.subr.bf16.mxu1 %v834_v0 }
 0x127   :  { %749 = vmatpush3.bf16.msra.mxu1 %v796_v54 }
 0x128   :  { %750 = vmatprep.subr.bf16.mxu1 %v834_v0 }
 0x12b   :  { %751 = vmatpush3.bf16.msra.mxu1 %v797_v3 }
 0x12c   :  { %752 = vmatprep.subr.bf16.mxu1 %v834_v0  ;;  %v466_v0 = vrot.slane %v919_v34, %v465_v16 }
 0x12f   :  { %753 = vmatpush3.bf16.msra.mxu1 %v798_v4 }
 0x1e5   :  { %v325_v57 = vpop.f32.mrb[4].mxu1 }
 0x1e6   :  { %v326_v58 = vadd.f32 %v325_v57, %v242_v56  ;;  %v716_v59 = vpop.f32.mrb[5].mxu1 }
 0x1e7   :  { %v328_v60 = vpop.f32.mrb[6].mxu1 }
 0x1e8   :  { %v329_v61 = vadd.f32 %v328_v60, %v242_v56  ;;  %v717_v62 = vpop.f32.mrb[7].mxu1  ;;  %v332_v63 = vmax.f32 %v326_v58, 0.0 }
 0x1ea   :  { %v333_v1 = vmax.f32 %v329_v61, 0.0 }
 0x1ec   :  { %v334_v2 = vpack.c.bf16 %v333_v1, %v332_v63 }
 0x1ee   :  { %735 = vmatmul.mubr.bf16.vlgmr.msra.gmra.mrb[4].mxu0 %v334_v2 }
 0x2c1   :  { %v437_v7 = vpop.f32.mrb[4].mxu0 }
 0x2c2   :  { %v438_v8 = vadd.f32 %v437_v7, %v354_v6  ;;  %v736_v9 = vpop.f32.mrb[5].mxu0 }
 0x2c3   :  { %v440_v10 = vpop.f32.mrb[6].mxu0 }
 0x2c4   :  { %v441_v11 = vadd.f32 %v440_v10, %v354_v6  ;;  %v737_v12 = vpop.f32.mrb[7].mxu0  ;;  %v444_v13 = vmax.f32 %v438_v8, 0.0 }
 0x2c6   :  { %v445_v14 = vmax.f32 %v441_v11, 0.0 }
 0x2c8   :  { %v446_v15 = vpack.c.bf16 %v445_v14, %v444_v13 }
 0x2ca   :  { %755 = vmatmul.mubr.bf16.vlgmr.msra.gmra.mrb[8].mxu1 %v446_v15 }
 0x39d   :  { %v549_v17 = vpop.f32.mrb[8].mxu1 }
 0x39e   :  { %v550_v18 = vadd.f32 %v549_v17, %v466_v0  ;;  %v756_v19 = vpop.f32.mrb[9].mxu1 }
 0x39f   :  { %v552_v20 = vpop.f32.mrb[10].mxu1 }
 0x3a0   :  { %v620_v21 = vmul.f32 -1.442695, %v550_v18  ;;  %v553_v22 = vadd.f32 %v552_v20, %v466_v0  ;;  %v757_v23 = vpop.f32.mrb[11].mxu1 }
 0x3a2   :  { %799 = vpow2.f32 %v620_v21  ;;  %v621_v24 = vmul.f32 -1.442695, %v553_v22 }
 0x3a4   :  { %801 = vpow2.f32 %v621_v24 }
 0x3ac   :  { %v800_v25 = vpop.eup %799 }
 0x3ad   :  { %v562_v26 = vadd.f32 1.0, %v800_v25 }
 0x3ae   :  { %v802_v27 = vpop.eup %801 }
 0x3af   :  { %v563_v28 = vadd.f32 1.0, %v802_v27  ;;  %803 = vrcp.f32 %v562_v26 }
 0x3b1   :  { %805 = vrcp.f32 %v563_v28 }
 0x3b9   :  { %v804_v29 = vpop.eup %803 }
 0x3bb   :  { %v806_v30 = vpop.eup %805 }
 0x3bc   :  { %v629_v31 = vpack.c.bf16 %v806_v30, %v804_v29 }
 0x3be   :  { %630 = vst [vmem:[%s945_s4] sm:$0xff] %v629_v31  }
 0x3bf   :  { %582 = vsyncpa [#allocation3], 1 }

</bundles_post_ra>
